<compile_context>
chip_gen: v7x
topology: tpu7x:2x2x1
jax: 0.10.0
libtpu: 0.0.40
codegen_flags: <defaults>
</compile_context>

<pallas_src>
import jax
import jax.numpy as jnp
from jax.experimental import pallas as pl
from jax.experimental.pallas import tpu as pltpu


def _round_up(x, m):
    return ((x + m - 1) // m) * m


def _round_down(x, m):
    return (x // m) * m


def _projection_kernel(w_ref, wt_ref, src_ref, tgt_ref, out_ref):
    """One row-tile of: out = target + ((source - target) @ W) @ W^T.

    w_ref   : (D, r)   W,   resident across the grid (constant index_map)
    wt_ref  : (r, D)   W^T, resident across the grid (constant index_map)
    src_ref : (rt, D)  source rows
    tgt_ref : (rt, D)  target rows
    out_ref : (rt, D)  output rows
    """
    src = src_ref[...]
    tgt = tgt_ref[...]
    w = w_ref[...]                                   # (D, r)
    wt = wt_ref[...]                                 # (r, D)

    # Compute the difference in f32 (avoids cancellation when source ~= target),
    # then feed the MXU in the weight dtype; accumulate in f32.
    diff = src.astype(jnp.float32) - tgt.astype(jnp.float32)      # (rt, D)
    coeff = jnp.dot(diff.astype(w.dtype), w,
                    preferred_element_type=jnp.float32)           # (rt, r)
    delta = jnp.dot(coeff.astype(wt.dtype), wt,
                    preferred_element_type=jnp.float32)           # (rt, D)

    out_ref[...] = (tgt.astype(jnp.float32) + delta).astype(out_ref.dtype)


def low_rank_orthogonal_projection(source, target, weight):
    """source, target: (batch, seq, embed_dim); weight: (embed_dim, rank)."""
    B, S, D = source.shape
    D_w, r = weight.shape
    assert D_w == D, "weight must be (embed_dim, rank)"
    N = B * S

    src2d = source.reshape(N, D)
    tgt2d = target.reshape(N, D)
    wt = weight.T                                   # (r, D) — tiny, one-time

    itemsize = jnp.dtype(source.dtype).itemsize
    w_itemsize = jnp.dtype(weight.dtype).itemsize

    # --- Generation-aware tile sizing -------------------------------------
    # Working set ~ 2 buffers x 3 arrays (src, tgt, out) x rt x D x itemsize
    # plus the resident W / W^T. Keep it under ~half of physical VMEM so the
    # same code is safe on v7x (64 MiB/TC) and can grow on v5e/v6e (128 MiB).
    try:
        vmem_cap = int(pltpu.get_tpu_info().vmem_capacity_bytes)
    except Exception:
        vmem_cap = 64 << 20                          # conservative (v7x)
    tile_budget = max(8 << 20, min(vmem_cap // 2, 48 << 20))

    rt = tile_budget // (6 * D * itemsize)
    rt = _round_down(rt, 8)
    rt = max(8, min(rt, 4096, _round_up(N, 8)))      # small D -> big rt, tiny N -> clamp

    weight_bytes = 4 * r * D * w_itemsize            # W + W^T, double-buffered
    working_set = 6 * rt * D * itemsize + weight_bytes
    vmem_limit = int(max(32 << 20,
                         min(working_set + (16 << 20), vmem_cap - (8 << 20))))

    grid = (pl.cdiv(N, rt),)

    out2d = pl.pallas_call(
        _projection_kernel,
        out_shape=jax.ShapeDtypeStruct((N, D), source.dtype),
        grid_spec=pltpu.PrefetchScalarGridSpec(
            num_scalar_prefetch=0,
            grid=grid,
            in_specs=[
                # W and W^T: full array, constant index_map -> stay resident.
                pl.BlockSpec((D, r), lambda i: (0, 0)),
                pl.BlockSpec((r, D), lambda i: (0, 0)),
                pl.BlockSpec((rt, D), lambda i: (i, 0)),
                pl.BlockSpec((rt, D), lambda i: (i, 0)),
            ],
            out_specs=pl.BlockSpec((rt, D), lambda i: (i, 0)),
        ),
        compiler_params=pltpu.CompilerParams(
            dimension_semantics=("parallel",),
            vmem_limit_bytes=vmem_limit),
        cost_estimate=pl.CostEstimate(
            flops=4 * N * D * r,
            bytes_accessed=3 * N * D * itemsize + 2 * D * r * w_itemsize,
            transcendentals=0),
    )(weight, wt, src2d, tgt2d)

    return out2d.reshape(B, S, D)


def _reference(source, target, weight):
    P = weight @ weight.T
    oc = jnp.eye(P.shape[0], dtype=P.dtype) - P
    return target @ oc.T + source @ P.T


if __name__ == "__main__":
    # Small shapes consistent with the module's forward:
    # source/target: (batch, seq, embed_dim); weight: (embed_dim, rank)
    batch, seq, embed_dim, rank = 2, 8, 128, 4

    key = jax.random.PRNGKey(0)
    k_w, k_s, k_t = jax.random.split(key, 3)

    # Orthonormal columns (mirrors torch orthogonal init + orthogonal
    # parametrization): QR of a random Gaussian matrix, done host-side.
    # TODO(synk): the nn.utils.parametrizations.orthogonal re-parametrization
    # itself has no in-kernel equivalent; the kernel assumes an orthonormal W.
    raw = jax.random.normal(k_w, (embed_dim, rank), dtype=jnp.float32)
    q, _ = jnp.linalg.qr(raw)
    weight = q[:, :rank]                                   # (embed_dim, rank)

    source = jax.random.normal(k_s, (batch, seq, embed_dim), dtype=jnp.float32)
    target = jax.random.normal(k_t, (batch, seq, embed_dim), dtype=jnp.float32)

    out = low_rank_orthogonal_projection(source, target, weight)
    out = jax.block_until_ready(out)

    ref = _reference(source, target, weight)
    assert out.shape == (batch, seq, embed_dim)
    assert jnp.allclose(out, ref, atol=1e-4, rtol=1e-4)

    print("KERNEL_OK")
</pallas_src>

<mosaic_0001>
module attributes {stable_mosaic.version = 11 : i64} {
  func.func @_projection_kernel(%arg0: i32, %arg1: memref<128x4xf32, #tpu.memory_space<vmem>>, %arg2: memref<4x128xf32, #tpu.memory_space<vmem>>, %arg3: memref<16x128xf32, #tpu.memory_space<vmem>>, %arg4: memref<16x128xf32, #tpu.memory_space<vmem>>, %arg5: memref<16x128xf32, #tpu.memory_space<vmem>>) attributes {dimension_semantics = [#tpu.dimension_semantics<parallel>], iteration_bounds = array<i64: 1>, scalar_prefetch = 0 : i64, scratch_operands = 0 : i64, tpu.core_type = #tpu.core_type<tc>, window_params = [{pipeline_mode = #tpu.pipeline_mode<synchronous>, transform_indices = @transform_0, window_bounds = array<i64: 128, 4>}, {pipeline_mode = #tpu.pipeline_mode<synchronous>, transform_indices = @transform_1, window_bounds = array<i64: 4, 128>}, {transform_indices = @transform_2, window_bounds = array<i64: 16, 128>}, {transform_indices = @transform_3, window_bounds = array<i64: 16, 128>}, {transform_indices = @transform_4, window_bounds = array<i64: 16, 128>}]} {
    %c0 = arith.constant 0 : index
    %c0_0 = arith.constant 0 : index
    %0 = vector.load %arg3[%c0, %c0_0] : memref<16x128xf32, #tpu.memory_space<vmem>>, vector<16x128xf32>
    %c0_1 = arith.constant 0 : index
    %c0_2 = arith.constant 0 : index
    %1 = vector.load %arg4[%c0_1, %c0_2] : memref<16x128xf32, #tpu.memory_space<vmem>>, vector<16x128xf32>
    %c0_3 = arith.constant 0 : index
    %c0_4 = arith.constant 0 : index
    %2 = vector.load %arg1[%c0_3, %c0_4] : memref<128x4xf32, #tpu.memory_space<vmem>>, vector<128x4xf32>
    %c0_5 = arith.constant 0 : index
    %c0_6 = arith.constant 0 : index
    %3 = vector.load %arg2[%c0_5, %c0_6] : memref<4x128xf32, #tpu.memory_space<vmem>>, vector<4x128xf32>
    %4 = arith.subf %0, %1 : vector<16x128xf32>
    %cst = arith.constant dense<0.000000e+00> : vector<16x4xf32>
    %5 = tpu.matmul %4, %2, %cst {dimension_numbers = #tpu.dot_dimension_numbers<[1], [0], [0], [1], [0, 0, 1, 1], [], []>} : vector<16x128xf32>, vector<128x4xf32>, vector<16x4xf32> -> vector<16x4xf32>
    %cst_7 = arith.constant dense<0.000000e+00> : vector<16x128xf32>
    %6 = tpu.matmul %5, %3, %cst_7 {dimension_numbers = #tpu.dot_dimension_numbers<[1], [0], [0], [1], [0, 0, 1, 1], [], []>} : vector<16x4xf32>, vector<4x128xf32>, vector<16x128xf32> -> vector<16x128xf32>
    %7 = arith.addf %1, %6 : vector<16x128xf32>
    %c0_8 = arith.constant 0 : index
    %c0_9 = arith.constant 0 : index
    %8 = vector.load %arg5[%c0_8, %c0_9] : memref<16x128xf32, #tpu.memory_space<vmem>>, vector<16x128xf32>
    tpu.vector_store %arg5[%c0_8, %c0_9], %7 {strides = array<i32>} : memref<16x128xf32, #tpu.memory_space<vmem>>, vector<16x128xf32>,
    return
  }
  func.func @transform_0(%arg0: i32) -> (i32, i32) {
    %c0_i32 = arith.constant 0 : i32
    %c0_i32_0 = arith.constant 0 : i32
    %c0_i32_1 = arith.constant 0 : i32
    return %c0_i32, %c0_i32_0 : i32, i32
  }
  func.func @transform_1(%arg0: i32) -> (i32, i32) {
    %c0_i32 = arith.constant 0 : i32
    %c0_i32_0 = arith.constant 0 : i32
    %c0_i32_1 = arith.constant 0 : i32
    return %c0_i32, %c0_i32_0 : i32, i32
  }
  func.func @transform_2(%arg0: i32) -> (i32, i32) {
    %c0_i32 = arith.constant 0 : i32
    %c0_i32_0 = arith.constant 0 : i32
    return %arg0, %c0_i32 : i32, i32
  }
  func.func @transform_3(%arg0: i32) -> (i32, i32) {
    %c0_i32 = arith.constant 0 : i32
    %c0_i32_0 = arith.constant 0 : i32
    return %arg0, %c0_i32 : i32, i32
  }
  func.func @transform_4(%arg0: i32) -> (i32, i32) {
    %c0_i32 = arith.constant 0 : i32
    %c0_i32_0 = arith.constant 0 : i32
    return %arg0, %c0_i32 : i32, i32
  }
}

</mosaic_0001>

<bundles_post_ra>
// kernel: tpu_custom_call.1
= control target key start
LH: loop header
LB: loop body
LE: loop exit
PB: predicated region body
PF: predicated region fallthrough
CT: control target
= control target key end

     0   :  { %s448_s0 = inlined_call_operand.vmem [shape: f32[128,4], index: 0, kind: input, shape index: {}]   ;;  %s449_s1 = inlined_call_operand.vmem [shape: f32[4,128], index: 1, kind: input, shape index: {}]   ;;  %s450_s2 = inlined_call_operand.vmem [shape: f32[16,128], index: 2, kind: input, shape index: {}]   ;;  %s451_s3 = inlined_call_operand.vmem [shape: f32[16,128], index: 3, kind: input, shape index: {}]   ;;  %s452_s4 = inlined_call_operand.hbm [shape: f32[16,128], index: 4, kind: output, shape index: {}]  }
   0x1   :  { %v22_v0 = vld [vmem:[%s448_s0] sm:$0xff]  ;;  %v23_v1 = vld [vmem:[%s448_s0 + $0x8] sm:$0xff]  ;;  %v24_v2 = vld [vmem:[%s448_s0 + $0x10] sm:$0xff] }
   0x2   :  { %v286_v3 = vpack.c.bf16 %v23_v1, %v22_v0  ;;  %v25_v4 = vld [vmem:[%s448_s0 + $0x18] sm:$0xff]  ;;  %v26_v6 = vld [vmem:[%s448_s0 + $0x20] sm:$0xff]  ;;  %v27_v7 = vld [vmem:[%s448_s0 + $0x28] sm:$0xff] }
   0x3   :  { %v290_v5 = vpack.c.bf16 %v25_v4, %v24_v2  ;;  %v294_v8 = vpack.c.bf16 %v27_v7, %v26_v6  ;;  %v18_v9 = vld [vmem:[%s450_s2] sm:$0xff]  ;;  %v28_v11 = vld [vmem:[%s448_s0 + $0x30] sm:$0xff]  ;;  %v29_v12 = vld [vmem:[%s448_s0 + $0x38] sm:$0xff] }
   0x4   :  { %287 = vmatprep.subr.bf16.mxu0 %v286_v3  ;;  %v20_v10 = vld [vmem:[%s451_s3] sm:$0xff] }
   0x5   :  { %289 = vmatpush3.bf16.msra.mxu0 %v286_v3  ;;  %v39_v13 = vsub.f32 %v18_v9, %v20_v10 }
   0x6   :  { %291 = vmatprep.subr.bf16.mxu0 %v290_v5 }
   0x7   :  { %9 = vsyncpa [#allocation3], 0  ;;  %278 = vmatprep.mubr.f32.mxu0 %v39_v13  ;;  %v298_v14 = vpack.c.bf16 %v29_v12, %v28_v11  ;;  %v30_v15 = vld [vmem:[%s448_s0 + $0x40] sm:$0xff]  ;;  %v31_v16 = vld [vmem:[%s448_s0 + $0x48] sm:$0xff]  ;;  %vm123_vm0 = vcmask 1043456   ;;  %vm116_vm1 = vcmask 31744  }
   0x8   :  { %v302_v17 = vpack.c.bf16 %v31_v16, %v30_v15  ;;  %v32_v18 = vld [vmem:[%s448_s0 + $0x50] sm:$0xff]  ;;  %v33_v19 = vld [vmem:[%s448_s0 + $0x58] sm:$0xff]  ;;  %v34_v21 = vld [vmem:[%s448_s0 + $0x60] sm:$0xff] }
   0x9   :  { %293 = vmatpush3.bf16.msra.mxu0 %v290_v5  ;;  %v306_v20 = vpack.c.bf16 %v33_v19, %v32_v18  ;;  %v35_v22 = vld [vmem:[%s448_s0 + $0x68] sm:$0xff]  ;;  %v36_v24 = vld [vmem:[%s448_s0 + $0x70] sm:$0xff]  ;;  %v37_v25 = vld [vmem:[%s448_s0 + $0x78] sm:$0xff]  ;;  %s345_s0 = smov [#allocation2]  }
   0xa   :  { %295 = vmatprep.subr.bf16.mxu0 %v294_v8  ;;  %v310_v23 = vpack.c.bf16 %v35_v22, %v34_v21  ;;  %v314_v26 = vpack.c.bf16 %v37_v25, %v36_v24  ;;  %v19_v27 = vld [vmem:[%s450_s2 + $0x8] sm:$0xff]  ;;  %v38_v30 = vld [vmem:[%s449_s1] sm:$0xf]  ;;  %s211_s2 = sshll.u32 %s345_s0, 4  ;;  %s212_s2 = int_to_ptr.vmem [resolvable:$true] %s211_s2 }
   0xb   :  { %v21_v28 = vld [vmem:[%s451_s3 + $0x8] sm:$0xff]  ;;  %281 = vmatprep.subr.msk.mxu1 %vm123_vm0, %v38_v30  ;;  %s321_s3 = scalar_lea.vmem %s212_s2, 256  ;;  %p326_p1 = scmp.lt.s32.totalorder %s212_s2, %s212_s2 }
   0xc   :  { %v40_v29 = vsub.f32 %v19_v27, %v21_v28  ;;  %282 = vmatpush3.msk.msra.mxu1 %vm123_vm0, %v38_v30  ;;  %p322_p0 = scmp.ne.s32.totalorder %s212_s2, %s321_s3  ;;  %p327_p2 = scmp.lt.s32.totalorder %s321_s3, %s321_s3 }
   0xd   :  { %297 = vmatpush3.bf16.msra.mxu0 %v294_v8 }
   0xe   :  { %299 = vmatprep.subr.bf16.mxu0 %v298_v14  ;;  %p328_p3 = por %p327_p2, %p326_p1 }
  0x10   :  { %p329_p4 = pnand %p328_p3, %p322_p0 }
  0x11   :  { %301 = vmatpush3.bf16.msra.mxu0 %v298_v14 }
  0x12   :  { %303 = vmatprep.subr.bf16.mxu0 %v302_v17 }
  0x15   :  { %305 = vmatpush3.bf16.msra.mxu0 %v302_v17 }
  0x16   :  { %307 = vmatprep.subr.bf16.mxu0 %v306_v20 }
  0x19   :  { %309 = vmatpush3.bf16.msra.mxu0 %v306_v20 }
  0x1a   :  { %311 = vmatprep.subr.bf16.mxu0 %v310_v23 }
  0x1d   :  { %313 = vmatpush3.bf16.msra.mxu0 %v310_v23 }
  0x1e   :  { %315 = vmatprep.subr.bf16.mxu0 %v314_v26 }
  0x21   :  { %317 = vmatpush3.bf16.msra.mxu0 %v314_v26 }
  0x24   :  { %279 = vmatmul.mubr.f32.vlgmr.msra.gmra.mrb[0].mxu0 %v40_v29 }
  0xf7   :  { %v280_v31 = vpop.f32.mrb[0].mxu0 }
  0xf8   :  { %v107_v32 = vpop.f32.mrb[1].mxu0 }
  0xf9   :  { %283 = vmatprep.mubr.msk.f32.mxu1 %vm116_vm1, %v107_v32 }
  0xfa   :  { %284 = vmatmul.mubr.msk.f32.vlgmr.msra.gmra.mrb[0].mxu1 %vm116_vm1, %v280_v31 }
 0x1cd   :  { %v285_v33 = vpop.f32.mrb[0].mxu1 }
 0x1ce   :  { %v203_v34 = vadd.f32 %v285_v33, %v21_v28  ;;  %v193_v35 = vpop.f32.mrb[1].mxu1 }
 0x1cf   :  { %v202_v36 = vadd.f32 %v193_v35, %v20_v10 }
 0x1d0   :  { %205 = vst [vmem:[#allocation2 + $0x8] sm:$0xff] %v203_v34 }
 0x1d1   :  { %204 = vst [vmem:[#allocation2] sm:$0xff] %v202_v36 }
 0x1d2   :  { %332 = shalt.err (!%p329_p4)
}
 0x1d3   :  { %s333_s6 = scalar_lea.hbm %s452_s4, 256 }
 0x1d4   :  { %p334_p5 = scmp.ne.s32.totalorder %s452_s4, %s333_s6  ;;  %p337_p6 = scmp.lt.u32.totalorder %s333_s6, %s452_s4 }
 0x1d6   :  { %p339_p7 = pnand %p337_p6, %p334_p5 }
 0x1d8   :  { %342 = shalt.err (!%p339_p7)
}
 0x1d9   :  { %s346_s11 = smov 128   ;;  %s347_s12 = smov 8  }
 0x1da   :  { %217 = dma.vmem_to_hbm [thread:$0]  %s212_s2, 256, %s452_s4, [#allocation3], %s346_s11, %s346_s11, %s347_s12  }
 0x1db   :  { %343 = dma.done.wait [#allocation3], 256  }
 0x1dc   :  { %344 = vsyncadd [#allocation3], 4294967040 }
 0x1dd   :  { %221 = vsyncpa [#allocation3], 1 }

</bundles_post_ra>
